<compile_context>
chip_gen: v5e
topology: v5e:2x2
jax: 0.10.0
libtpu: 0.0.40
codegen_flags: <defaults>
</compile_context>

<pallas_src>
import functools

import jax
import jax.numpy as jnp
from jax import lax
from jax.experimental import pallas as pl
from jax.experimental.pallas import tpu as pltpu


def moe_kernel(x_ref, wf_ref, bf_ref, aux_ref, o_ref, *, num_experts, hidden_dim):
    """One batch tile of the fused MoE forward.

    x_ref   : (TB, D)        input rows (batch-tiled, double-buffered)
    wf_ref  : (E*H + E, D)   [all-expert fc1 ; gating] weights, PyTorch
                             [out, in] layout, resident in VMEM (bf16 MXU operand)
    bf_ref  : (1, E*H + E)   [all-expert fc1 bias ; gating bias]   (f32)
    aux_ref : (1, E*H + E)   [flat fc2 weights w2 ; fc2 biases b2] (f32)
    o_ref   : (TB, 1)        gate-weighted mixture output
    """
    eh = num_experts * hidden_dim
    x = x_ref[...]

    # ---- single fused MXU pass: [fc1 of every expert | gating logits] ----
    # Contract the input_dim axis of both operands (weights stored [out, in]);
    # bf16 operands, f32 accumulation via preferred_element_type.
    z = lax.dot_general(
        x.astype(wf_ref.dtype), wf_ref[...],
        dimension_numbers=(((1,), (1,)), ((), ())),
        preferred_element_type=jnp.float32,
    ) + bf_ref[...]                                   # (TB, E*H + E), f32

    h = jnp.maximum(z[:, :eh], 0.0)                   # (TB, E*H) hidden, lane-dense
    logits = z[:, eh:]                                # (TB, E)   gating logits

    # ---- gating softmax (f32 on VPU/EUP; exact divide -> gates sum to 1) ----
    m = jnp.max(logits, axis=-1, keepdims=True)
    p = jnp.exp(logits - m)
    gates = p / jnp.sum(p, axis=-1, keepdims=True)    # (TB, E)

    # ---- fc2 + gate-weighted mixture on VPU/XLU (no narrow-N MXU pass) ----
    w2_row = aux_ref[:, :eh]                          # (1, E*H) flat fc2 weights
    b2_row = aux_ref[:, eh:]                          # (1, E)   fc2 biases
    t = h * w2_row                                    # (TB, E*H), VPU

    # gates . b2 term, then per-expert lane reductions of t (static unroll, E tiny).
    mix = jnp.sum(gates * b2_row, axis=-1, keepdims=True)        # (TB, 1)
    for e in range(num_experts):
        pe = jnp.sum(t[:, e * hidden_dim:(e + 1) * hidden_dim],
                     axis=-1, keepdims=True)                     # (TB, 1)
        mix = mix + gates[:, e:e + 1] * pe

    # TODO(synk): the PyTorch line `gates.unsqueeze(-1) * expert_outputs` only
    # broadcasts when batch == num_experts; we implement the clearly intended
    # semantics  sum_e gates[b, e] * expert_out[b, e]  -> [batch].
    # TODO(synk): for very large B a lane-dense (grid, TB) output layout would
    # avoid masked stores of this (TB, 1) column; negligible at these sizes.
    o_ref[...] = mix.astype(o_ref.dtype)


def _pick_batch_tile(batch):
    """Largest multiple-of-8 row tile dividing the batch, capped so the grid
    has >= 2 steps (v7x 2-TC sharding + DMA/compute overlap) and at 512 rows.
    Falls back to the full batch (grid=(1,)) for tiny/odd batches."""
    cap = min(512, batch // 2)
    best = 0
    tb = 8
    while tb <= cap:
        if batch % tb == 0:
            best = tb
        tb += 8
    return best if best > 0 else batch


@functools.partial(jax.jit, static_argnames=("mxu_dtype",))
def moe_forward(x, gate_w, gate_b, w1, b1, w2, b2, *, mxu_dtype=jnp.bfloat16):
    """x: [B, D]; gate_w: [E, D]; gate_b: [E]; w1: [E, H, D]; b1: [E, H];
    w2: [E, H]; b2: [E].  Returns the gate-weighted mixture, shape [B]."""
    B, D = x.shape
    E, H, _ = w1.shape
    EH = E * H

    # Layout-only repacking (contiguous reshapes + concats, no big transposes):
    #   wf  : [all-expert fc1 ; gating] weights, [out, in] layout, bf16 for MXU
    #   bf  : matching biases                               (f32, VPU adds)
    #   aux : [flat fc2 weights ; fc2 biases]               (f32, VPU/XLU path)
    wf = jnp.concatenate([w1.reshape(EH, D), gate_w], axis=0).astype(mxu_dtype)
    bf = jnp.concatenate([b1.reshape(EH), gate_b]).reshape(1, EH + E).astype(jnp.float32)
    aux = jnp.concatenate([w2.reshape(EH), b2]).reshape(1, EH + E).astype(jnp.float32)

    tb = _pick_batch_tile(B)
    grid = (B // tb,)

    # VMEM budget from actual buffer sizes: resident weights (x2 buffers by
    # default -- their constant index_map means they are only DMA'd once),
    # double-buffered x / out tiles, plus headroom.  Floor 32 MiB, cap 48 MiB
    # so it also respects v7x's 64 MiB/TC; raise toward ~100 MiB on v5e/v6e
    # only if the resident weights actually need it.
    itemsize = jnp.dtype(mxu_dtype).itemsize
    resident = (EH + E) * D * itemsize + 2 * (EH + E) * 4
    streamed = 2 * tb * D * 4 + 2 * tb * 4
    need = 2 * resident + streamed + (1 << 20)
    vmem_limit = int(min(max(need, 32 * 1024 * 1024), 48 * 1024 * 1024))

    # TODO(synk): when (E*H + E) * D no longer fits resident in VMEM, add a
    # reduction grid axis over D ('arbitrary', f32 VMEM accumulator with
    # pl.when init/finalize) or tile E*H along N instead of keeping the fused
    # weight fully resident.  (On v7x, pipeline_mode=pl.Buffered(1) on the
    # constant-index-map weight specs would also halve their footprint.)
    out = pl.pallas_call(
        functools.partial(moe_kernel, num_experts=E, hidden_dim=H),
        out_shape=jax.ShapeDtypeStruct((B, 1), jnp.float32),
        grid_spec=pltpu.PrefetchScalarGridSpec(
            num_scalar_prefetch=0,
            grid=grid,
            in_specs=[
                pl.BlockSpec((tb, D), lambda i: (i, 0)),        # x: batch-tiled
                pl.BlockSpec((EH + E, D), lambda i: (0, 0)),    # fused W (resident)
                pl.BlockSpec((1, EH + E), lambda i: (0, 0)),    # fused fc1+gate bias
                pl.BlockSpec((1, EH + E), lambda i: (0, 0)),    # [w2 | b2]
            ],
            out_specs=pl.BlockSpec((tb, 1), lambda i: (i, 0)),
        ),
        compiler_params=pltpu.CompilerParams(
            dimension_semantics=("parallel",),   # shard batch tiles over v7x's 2 TCs
            vmem_limit_bytes=vmem_limit,
        ),
    )(x, wf, bf, aux)
    return out[:, 0]


def moe_ref(x, gate_w, gate_b, w1, b1, w2, b2):
    """Pure-JAX reference of the intended MoE semantics (exact f32 matmuls)."""
    hp = jax.lax.Precision.HIGHEST
    gates = jax.nn.softmax(jnp.dot(x, gate_w.T, precision=hp) + gate_b, axis=1)
    expert_out = []
    for e in range(w1.shape[0]):
        h = jnp.maximum(jnp.dot(x, w1[e].T, precision=hp) + b1[e], 0.0)
        expert_out.append(jnp.dot(h, w2[e], precision=hp) + b2[e])
    expert_out = jnp.stack(expert_out, axis=1)                    # (B, E)
    return jnp.sum(gates * expert_out, axis=1)                    # (B,)


if __name__ == "__main__":
    # Small shapes consistent with the module; batch chosen so the grid has
    # >= 2 steps (tile=32 -> grid=(2,)).
    batch, input_dim, hidden_dim, num_experts = 64, 32, 32, 4

    key = jax.random.PRNGKey(0)
    keys = jax.random.split(key, 7)

    def uniform(k, shape, fan_in):
        bound = 1.0 / (fan_in ** 0.5)
        return jax.random.uniform(k, shape, minval=-bound, maxval=bound,
                                  dtype=jnp.float32)

    x = jax.random.normal(keys[0], (batch, input_dim), dtype=jnp.float32)
    gate_w = uniform(keys[1], (num_experts, input_dim), input_dim)
    gate_b = uniform(keys[2], (num_experts,), input_dim)
    w1 = uniform(keys[3], (num_experts, hidden_dim, input_dim), input_dim)
    b1 = uniform(keys[4], (num_experts, hidden_dim), input_dim)
    w2 = uniform(keys[5], (num_experts, hidden_dim), hidden_dim)
    b2 = uniform(keys[6], (num_experts,), hidden_dim)

    out = moe_forward(x, gate_w, gate_b, w1, b1, w2, b2)   # bf16 MXU operands
    out = jax.block_until_ready(out)
    assert out.shape == (batch,), out.shape

    # (1) Structural check: reference with the same bf16 rounding of the MXU
    #     operands, f32 everywhere else -> should match tightly.
    x_r = x.astype(jnp.bfloat16).astype(jnp.float32)
    gate_w_r = gate_w.astype(jnp.bfloat16).astype(jnp.float32)
    w1_r = w1.astype(jnp.bfloat16).astype(jnp.float32)
    ref_rounded = moe_ref(x_r, gate_w_r, gate_b, w1_r, b1, w2, b2)
    assert jnp.allclose(out, ref_rounded, atol=1e-3, rtol=1e-3), (out, ref_rounded)

    # (2) End-to-end check against the full-f32 module semantics; loose
    #     tolerance accounts for the bf16 MXU operands.
    ref = moe_ref(x, gate_w, gate_b, w1, b1, w2, b2)
    assert jnp.allclose(out, ref, atol=5e-2, rtol=5e-2), (out, ref)

    print("KERNEL_OK")
</pallas_src>

<mosaic_0001>
module attributes {stable_mosaic.version = 11 : i64} {
  func.func @moe_kernel(%arg0: i32, %arg1: memref<32x32xf32, #tpu.memory_space<vmem>>, %arg2: memref<132x32xbf16, #tpu.memory_space<vmem>>, %arg3: memref<1x132xf32, #tpu.memory_space<vmem>>, %arg4: memref<1x132xf32, #tpu.memory_space<vmem>>, %arg5: memref<32x1xf32, #tpu.memory_space<vmem>>) attributes {dimension_semantics = [#tpu.dimension_semantics<parallel>], iteration_bounds = array<i64: 2>, scalar_prefetch = 0 : i64, scratch_operands = 0 : i64, tpu.core_type = #tpu.core_type<tc>, window_params = [{transform_indices = @transform_0, window_bounds = array<i64: 32, 32>}, {pipeline_mode = #tpu.pipeline_mode<synchronous>, transform_indices = @transform_1, window_bounds = array<i64: 132, 32>}, {pipeline_mode = #tpu.pipeline_mode<synchronous>, transform_indices = @transform_2, window_bounds = array<i64: 1, 132>}, {pipeline_mode = #tpu.pipeline_mode<synchronous>, transform_indices = @transform_3, window_bounds = array<i64: 1, 132>}, {transform_indices = @transform_4, window_bounds = array<i64: 32, 1>}]} {
    %c0 = arith.constant 0 : index
    %c0_0 = arith.constant 0 : index
    %0 = vector.load %arg1[%c0, %c0_0] : memref<32x32xf32, #tpu.memory_space<vmem>>, vector<32x32xf32>
    %1 = arith.truncf %0 : vector<32x32xf32> to vector<32x32xbf16>
    %c0_1 = arith.constant 0 : index
    %c0_2 = arith.constant 0 : index
    %2 = vector.load %arg2[%c0_1, %c0_2] : memref<132x32xbf16, #tpu.memory_space<vmem>>, vector<132x32xbf16>
    %cst = arith.constant dense<0.000000e+00> : vector<32x132xf32>
    %3 = tpu.matmul %1, %2, %cst {dimension_numbers = #tpu.dot_dimension_numbers<[1], [1], [0], [0], [0, 0, 1, 0], [], []>} : vector<32x32xbf16>, vector<132x32xbf16>, vector<32x132xf32> -> vector<32x132xf32>
    %c0_3 = arith.constant 0 : index
    %c0_4 = arith.constant 0 : index
    %4 = vector.load %arg3[%c0_3, %c0_4] : memref<1x132xf32, #tpu.memory_space<vmem>>, vector<1x132xf32>
    %5 = vector.broadcast %4 : vector<1x132xf32> to vector<32x132xf32>
    %6 = arith.addf %3, %5 : vector<32x132xf32>
    %7 = vector.extract_strided_slice %6 {offsets = [0, 0], sizes = [32, 128], strides = [1, 1]} : vector<32x132xf32> to vector<32x128xf32>
    %cst_5 = arith.constant 0.000000e+00 : f32
    %8 = vector.broadcast %cst_5 : f32 to vector<32x128xf32>
    %9 = arith.maximumf %7, %8 : vector<32x128xf32>
    %10 = vector.extract_strided_slice %6 {offsets = [0, 128], sizes = [32, 4], strides = [1, 1]} : vector<32x132xf32> to vector<32x4xf32>
    %cst_6 = arith.constant dense<0xFF800000> : vector<32xf32>
    %11 = vector.multi_reduction <maximumf>, %10, %cst_6 [1] : vector<32x4xf32> to vector<32xf32>
    %12 = vector.shape_cast %11 : vector<32xf32> to vector<32x1xf32>
    %13 = vector.broadcast %12 : vector<32x1xf32> to vector<32x4xf32>
    %14 = arith.subf %10, %13 : vector<32x4xf32>
    %15 = math.exp %14 : vector<32x4xf32>
    %cst_7 = arith.constant dense<0.000000e+00> : vector<32xf32>
    %16 = vector.multi_reduction <add>, %15, %cst_7 [1] : vector<32x4xf32> to vector<32xf32>
    %17 = vector.shape_cast %16 : vector<32xf32> to vector<32x1xf32>
    %18 = vector.broadcast %17 : vector<32x1xf32> to vector<32x4xf32>
    %19 = arith.divf %15, %18 : vector<32x4xf32>
    %c0_8 = arith.constant 0 : index
    %c0_9 = arith.constant 0 : index
    %20 = vector.load %arg4[%c0_8, %c0_9] : memref<1x132xf32, #tpu.memory_space<vmem>>, vector<1x128xf32>
    %c0_10 = arith.constant 0 : index
    %c128 = arith.constant 128 : index
    %21 = vector.load %arg4[%c0_10, %c128] : memref<1x132xf32, #tpu.memory_space<vmem>>, vector<1x4xf32>
    %22 = vector.broadcast %20 : vector<1x128xf32> to vector<32x128xf32>
    %23 = arith.mulf %9, %22 : vector<32x128xf32>
    %24 = vector.broadcast %21 : vector<1x4xf32> to vector<32x4xf32>
    %25 = arith.mulf %19, %24 : vector<32x4xf32>
    %cst_11 = arith.constant dense<0.000000e+00> : vector<32xf32>
    %26 = vector.multi_reduction <add>, %25, %cst_11 [1] : vector<32x4xf32> to vector<32xf32>
    %27 = vector.shape_cast %26 : vector<32xf32> to vector<32x1xf32>
    %28 = vector.extract_strided_slice %23 {offsets = [0, 0], sizes = [32, 32], strides = [1, 1]} : vector<32x128xf32> to vector<32x32xf32>
    %cst_12 = arith.constant dense<0.000000e+00> : vector<32xf32>
    %29 = vector.multi_reduction <add>, %28, %cst_12 [1] : vector<32x32xf32> to vector<32xf32>
    %30 = vector.shape_cast %29 : vector<32xf32> to vector<32x1xf32>
    %31 = vector.extract_strided_slice %19 {offsets = [0, 0], sizes = [32, 1], strides = [1, 1]} : vector<32x4xf32> to vector<32x1xf32>
    %32 = arith.mulf %31, %30 : vector<32x1xf32>
    %33 = arith.addf %27, %32 : vector<32x1xf32>
    %34 = vector.extract_strided_slice %23 {offsets = [0, 32], sizes = [32, 32], strides = [1, 1]} : vector<32x128xf32> to vector<32x32xf32>
    %cst_13 = arith.constant dense<0.000000e+00> : vector<32xf32>
    %35 = vector.multi_reduction <add>, %34, %cst_13 [1] : vector<32x32xf32> to vector<32xf32>
    %36 = vector.shape_cast %35 : vector<32xf32> to vector<32x1xf32>
    %37 = vector.extract_strided_slice %19 {offsets = [0, 1], sizes = [32, 1], strides = [1, 1]} : vector<32x4xf32> to vector<32x1xf32>
    %38 = arith.mulf %37, %36 : vector<32x1xf32>
    %39 = arith.addf %33, %38 : vector<32x1xf32>
    %40 = vector.extract_strided_slice %23 {offsets = [0, 64], sizes = [32, 32], strides = [1, 1]} : vector<32x128xf32> to vector<32x32xf32>
    %cst_14 = arith.constant dense<0.000000e+00> : vector<32xf32>
    %41 = vector.multi_reduction <add>, %40, %cst_14 [1] : vector<32x32xf32> to vector<32xf32>
    %42 = vector.shape_cast %41 : vector<32xf32> to vector<32x1xf32>
    %43 = vector.extract_strided_slice %19 {offsets = [0, 2], sizes = [32, 1], strides = [1, 1]} : vector<32x4xf32> to vector<32x1xf32>
    %44 = arith.mulf %43, %42 : vector<32x1xf32>
    %45 = arith.addf %39, %44 : vector<32x1xf32>
    %46 = vector.extract_strided_slice %23 {offsets = [0, 96], sizes = [32, 32], strides = [1, 1]} : vector<32x128xf32> to vector<32x32xf32>
    %cst_15 = arith.constant dense<0.000000e+00> : vector<32xf32>
    %47 = vector.multi_reduction <add>, %46, %cst_15 [1] : vector<32x32xf32> to vector<32xf32>
    %48 = vector.shape_cast %47 : vector<32xf32> to vector<32x1xf32>
    %49 = vector.extract_strided_slice %19 {offsets = [0, 3], sizes = [32, 1], strides = [1, 1]} : vector<32x4xf32> to vector<32x1xf32>
    %50 = arith.mulf %49, %48 : vector<32x1xf32>
    %51 = arith.addf %45, %50 : vector<32x1xf32>
    %c0_16 = arith.constant 0 : index
    %c0_17 = arith.constant 0 : index
    %52 = vector.load %arg5[%c0_16, %c0_17] : memref<32x1xf32, #tpu.memory_space<vmem>>, vector<32x1xf32>
    tpu.vector_store %arg5[%c0_16, %c0_17], %51 {strides = array<i32>} : memref<32x1xf32, #tpu.memory_space<vmem>>, vector<32x1xf32>,
    return
  }
  func.func @transform_0(%arg0: i32) -> (i32, i32) {
    %c0_i32 = arith.constant 0 : i32
    %c0_i32_0 = arith.constant 0 : i32
    return %arg0, %c0_i32 : i32, i32
  }
  func.func @transform_1(%arg0: i32) -> (i32, i32) {
    %c0_i32 = arith.constant 0 : i32
    %c0_i32_0 = arith.constant 0 : i32
    %c0_i32_1 = arith.constant 0 : i32
    return %c0_i32, %c0_i32_0 : i32, i32
  }
  func.func @transform_2(%arg0: i32) -> (i32, i32) {
    %c0_i32 = arith.constant 0 : i32
    %c0_i32_0 = arith.constant 0 : i32
    %c0_i32_1 = arith.constant 0 : i32
    return %c0_i32, %c0_i32_0 : i32, i32
  }
  func.func @transform_3(%arg0: i32) -> (i32, i32) {
    %c0_i32 = arith.constant 0 : i32
    %c0_i32_0 = arith.constant 0 : i32
    %c0_i32_1 = arith.constant 0 : i32
    return %c0_i32, %c0_i32_0 : i32, i32
  }
  func.func @transform_4(%arg0: i32) -> (i32, i32) {
    %c0_i32 = arith.constant 0 : i32
    %c0_i32_0 = arith.constant 0 : i32
    return %arg0, %c0_i32 : i32, i32
  }
}

</mosaic_0001>

<bundles_post_ra>
// kernel: moe_forward.1
= control target key start
LH: loop header
LB: loop body
LE: loop exit
PB: predicated region body
PF: predicated region fallthrough
CT: control target
= control target key end

     0   :  { %s838_s15 = smov 0   ;;  %s1025_s0 = inlined_call_operand.vmem [shape: f32[64,32], index: 0, kind: input, shape index: {}]   ;;  %s1026_s1 = inlined_call_operand.vmem [shape: bf16[132,32], index: 1, kind: input, shape index: {}]   ;;  %s1027_s2 = inlined_call_operand.vmem [shape: f32[1,132], index: 2, kind: input, shape index: {}]   ;;  %s1028_s3 = inlined_call_operand.vmem [shape: f32[1,132], index: 3, kind: input, shape index: {}]   ;;  %s1029_s4 = inlined_call_operand.vmem [shape: f32[64,1], index: 4, kind: output, shape index: {}]  }
   0x1 LB: > { %s704_s16 = sadd.s32 4294967295, %s805_s15   ;;  %p708_p0 = scmp.ge.s32.totalorder %s805_s15, 1  ;;  %s805_s15 = sphi %s838_s15, %s14_s15  }
   0x2   : > { %p163_p1 = scmp.lt.s32.totalorder %s805_s15, 3 }
   0x4   : > { %p164_p2 = pnand %p708_p0, %p163_p1 }
   0x5   : > { %s709_s21 = sshll.u32 (!%p164_p2), %s704_s16, 2  ;;  %s807_s19 = smov (!%p164_p2), 32  }
   0x6   : > { %167 = sbr.rel (%p164_p2) target bundleno = 663 (0x297), region = 36  ;;  %p190_p3 = scmp.lt.s32.totalorder (!%p164_p2), %s709_s21, 7 }
   0x7   : > { %s808_s20 = smov (!%p164_p2), 64   ;;  %s809_s22 = smov (!%p164_p2), 96  }
   0x8   : > { %s810_s26 = smov (!%p164_p2), 127   ;;  %s812_s28 = smov (!%p164_p2), 126  }
   0xb   : > { %v758_v0 = vld [vmem:[%s1026_s1 + $0x38] sm:$0xff]  ;;  %vm274_vm0 = vcmask 261120   ;;  %v224_v1 = vld [vmem:[%s1026_s1 + $0x40] sm:$0x3]  ;;  %s1033_s21 = smov (!%p190_p3, %s709_s21), 7  ;;  %v757_v5 = vld [vmem:[%s1026_s1 + $0x30] sm:$0xff] }
   0xc   : > { %v264_v2 = vunpack.c.l.b16 %v224_v1  ;;  %v303_v3 = vsel %vm274_vm0, %v758_v0, 0  ;;  %s710_s24 = sshll.u32 %s1033_s21, 3  ;;  %v300_v9 = vsel %vm274_vm0, %v757_v5, 0  ;;  %v756_v11 = vld [vmem:[%s1026_s1 + $0x28] sm:$0xff]  ;;  %v755_v13 = vld [vmem:[%s1026_s1 + $0x20] sm:$0xff]  ;;  %v754_v18 = vld [vmem:[%s1026_s1 + $0x18] sm:$0xff] }
   0xd   : > { %308 = vmatpush.bf16.xpose.msra.mxu0 %v303_v3  ;;  %759 = vmatpush.bf16.xpose.msra.mxu2 %v303_v3  ;;  %s193_s27 = scalar_lea.vmem %s1025_s0, %s710_s24  ;;  %v297_v12 = vsel %vm274_vm0, %v756_v11, 0  ;;  %v294_v16 = vsel %vm274_vm0, %v755_v13, 0  ;;  %v291_v19 = vsel %vm274_vm0, %v754_v18, 0  ;;  %v753_v20 = vld [vmem:[%s1026_s1 + $0x10] sm:$0xff]  ;;  %v752_v22 = vld [vmem:[%s1026_s1 + $0x8] sm:$0xff]  ;;  %v751_v24 = vld [vmem:[%s1026_s1] sm:$0xff]  ;;  %s1007_s5 = scalar_lea.vmem %s1029_s4, %s710_s24 }
   0xe   : > { %v273_v4 = vpack.c.b16 %v264_v2, %v264_v2  ;;  %v202_v7 = vld [vmem:[%s193_s27] sm:$0xff]  ;;  %v203_v8 = vld [vmem:[%s193_s27 + $0x8] sm:$0xff]  ;;  %v204_v14 = vld [vmem:[%s193_s27 + $0x10] sm:$0xff]  ;;  %v288_v21 = vsel %vm274_vm0, %v753_v20, 0  ;;  %v285_v23 = vsel %vm274_vm0, %v752_v22, 0  ;;  %v282_v25 = vsel %vm274_vm0, %v751_v24, 0 }
   0xf   : > { %v206_v10 = vpack.c.bf16 %v203_v8, %v202_v7  ;;  %v205_v15 = vld [vmem:[%s193_s27 + $0x18] sm:$0xff]  ;;  %v225_v26 = vld [vmem:[%s1027_s2] sm:$0x3]  ;;  %vm350_vm1 = vcmask 31744   ;;  %s811_s27 = smov 125  }
  0x10   : > { %v306_v6 = vsel %vm274_vm0, %v273_v4, 0  ;;  %v207_v17 = vpack.c.bf16 %v205_v15, %v204_v14  ;;  %v228_v27 = vperm.slane %v225_v26, 1  ;;  %v227_v40 = vperm.slane %v225_v26, 0  ;;  %v781_v43 = vld [vmem:[%s1028_s3] ss:$0 sm:$0xff] }
  0x11   : > { %334 = vmatpush.bf16.xpose.msra.mxu1 %v306_v6 }
  0x15   : > { %309 = vmatpush.bf16.xpose.msra.mxu0 %v300_v9  ;;  %760 = vmatpush.bf16.xpose.msra.mxu2 %v300_v9 }
  0x18   : > { %747 = vmatmul.msk.bf16.vlgmr.msra.gmra.mxu1 %vm274_vm0, %v206_v10 }
  0x1d   : > { %310 = vmatpush.bf16.xpose.msra.mxu0 %v297_v12  ;;  %761 = vmatpush.bf16.xpose.msra.mxu2 %v297_v12 }
  0x25   : > { %311 = vmatpush.bf16.xpose.msra.mxu0 %v294_v16  ;;  %762 = vmatpush.bf16.xpose.msra.mxu2 %v294_v16 }
  0x28   : > { %748 = vmatmul.msk.bf16.gmra.mxu1 %vm274_vm0, %v207_v17 }
  0x2d   : > { %312 = vmatpush.bf16.xpose.msra.mxu0 %v291_v19  ;;  %763 = vmatpush.bf16.xpose.msra.mxu2 %v291_v19 }
  0x35   : > { %313 = vmatpush.bf16.xpose.msra.mxu0 %v288_v21  ;;  %764 = vmatpush.bf16.xpose.msra.mxu2 %v288_v21 }
  0x3d   : > { %314 = vmatpush.bf16.xpose.msra.mxu0 %v285_v23  ;;  %765 = vmatpush.bf16.xpose.msra.mxu2 %v285_v23 }
  0x45   : > { %315 = vmatpush.bf16.xpose.msra.mxu0 %v282_v25  ;;  %766 = vmatpush.bf16.xpose.msra.mxu2 %v282_v25 }
  0x4c   : > { %745 = vmatmul.msk.bf16.vlgmr.msra.gmra.mxu0 %vm274_vm0, %v206_v10  ;;  %746 = vmatmul.msk.bf16.vlgmr.msra.gmra.mxu2 %vm274_vm0, %v207_v17 }
  0x95   : > { %v336_v28 = vpop.f32.mrf.mxu1 }
  0x96   : > { %v897_v29 = vadd.f32 %v336_v28, %v228_v27 }
  0x98   : > { %v351_v30 = vsel %vm350_vm1, %v897_v29, -inf }
  0x99   : > { %352 = vmax.xlane.f32.xlu0 %v351_v30 }
  0x9d   : > { %v338_v31 = vpop.f32.mrf.mxu1 }
  0x9e   : > { %v901_v32 = vadd.f32 %v338_v31, %v228_v27 }
  0xa0   : > { %v354_v33 = vsel %vm350_vm1, %v901_v32, -inf }
  0xa1   : > { %355 = vmax.xlane.f32.xlu0 %v354_v33 }
  0xa5   : > { %v341_v34 = vpop.f32.mrf.mxu1 }
  0xa6   : > { %v342_v35 = vadd.f32 %v341_v34, %v228_v27 }
  0xa8   : > { %v357_v36 = vsel %vm350_vm1, %v342_v35, -inf }
  0xa9   : > { %358 = vmax.xlane.f32.xlu1 %v357_v36 }
  0xad   : > { %v343_v37 = vpop.f32.mrf.mxu1 }
  0xae   : > { %v344_v38 = vadd.f32 %v343_v37, %v228_v27 }
  0xb0   : > { %v360_v39 = vsel %vm350_vm1, %v344_v38, -inf }
  0xb1   : > { %361 = vmax.xlane.f32.xlu1 %v360_v39 }
  0xc9   : > { %v317_v41 = vpop.f32.mrf.mxu0 }
  0xca   : > { %v318_v42 = vadd.f32 %v317_v41, %v227_v40 }
  0xcc   : > { %v346_v44 = vmax.f32 %v318_v42, 0.0 }
  0xce   : > { %v452_v45 = vmul.f32 %v781_v43, %v346_v44 }
  0xcf   : > { %v322_v46 = vpop.f32.mrf.mxu2 }
  0xd0   : > { %595 = vrot.lane.b32.xlu2 %v452_v45, %s807_s19  ;;  %547 = vrot.lane.b32.xlu0 %v452_v45, %s808_s20  ;;  %v323_v51 = vadd.f32 %v322_v46, %v227_v40  ;;  %v475_v59 = vsel %vm274_vm0, %v452_v45, 0.0 }
  0xd1   : > { %499 = vrot.lane.b32.xlu1 %v452_v45, %s809_s22  ;;  %v319_v52 = vpop.f32.mrf.mxu0 }
  0xd2   : > { %v320_v53 = vadd.f32 %v319_v52, %v227_v40  ;;  %v348_v54 = vmax.f32 %v323_v51, 0.0 }
  0xd4   : > { %v347_v55 = vmax.f32 %v320_v53, 0.0  ;;  %v454_v56 = vmul.f32 %v781_v43, %v348_v54 }
  0xd6   : > { %v453_v57 = vmul.f32 %v781_v43, %v347_v55  ;;  %v481_v58 = vsel %vm274_vm0, %v454_v56, 0.0 }
  0xd7   : > { %v324_v47 = vpop.f32.mrf.mxu2 }
  0xd8   : > { %v325_v48 = vadd.f32 %v324_v47, %v227_v40  ;;  %v478_v60 = vsel %vm274_vm0, %v453_v57, 0.0 }
  0xda   : > { %v349_v49 = vmax.f32 %v325_v48, 0.0 }
  0xdc   : > { %v455_v50 = vmul.f32 %v781_v43, %v349_v49 }
  0xde   : > { %v484_v13 = vsel %vm274_vm0, %v455_v50, 0.0 }
  0xf9   : > { %482 = vadd.xlane.f32.xlu2 %v481_v58 }
  0xfa   : > { %476 = vadd.xlane.f32.xlu0 %v475_v59 }
  0xfb   : > { %479 = vadd.xlane.f32.xlu1 %v478_v60 }
 0x10c   : > { %v353_v3 = vpop.xlane.xlu0 %352 }
 0x10d   : > { %v363_v8 = vsub.f32 %v897_v29, %v353_v3 }
 0x10e   : > { %503 = vrot.lane.b32.xlu0 %v454_v56, %s809_s22 }
 0x10f   : > { %v367_v11 = vmul.f32 1.442695, %v363_v8 }
 0x111   : > { %501 = vrot.lane.b32.xlu2 %v453_v57, %s809_s22 }
 0x114   : > { %v356_v4 = vpop.xlane.xlu0 %355 }
 0x115   : > { %v364_v14 = vsub.f32 %v901_v32, %v356_v4 }
 0x116   : > { %551 = vrot.lane.b32.xlu0 %v454_v56, %s808_s20 }
 0x117   : > { %v369_v17 = vmul.f32 1.442695, %v364_v14 }
 0x119   : > { %549 = vrot.lane.b32.xlu2 %v453_v57, %s808_s20 }
 0x11c   : > { %v359_v61 = vpop.xlane.xlu1 %358 }
 0x11d   : > { %v365_v7 = vsub.f32 %v342_v35, %v359_v61 }
 0x11e   : > { %599 = vrot.lane.b32.xlu0 %v454_v56, %s807_s19 }
 0x11f   : > { %v371_v10 = vmul.f32 1.442695, %v365_v7 }
 0x121   : > { %597 = vrot.lane.b32.xlu2 %v453_v57, %s807_s19 }
 0x124   : > { %v362_v62 = vpop.xlane.xlu1 %361 }
 0x125   : > { %v366_v63 = vsub.f32 %v344_v38, %v362_v62 }
 0x126   : > { %553 = vrot.lane.b32.xlu0 %v455_v50, %s808_s20 }
 0x127   : > { %v373_v0 = vmul.f32 1.442695, %v366_v63 }
 0x129   : > { %783 = vpow2.f32 %v373_v0  ;;  %505 = vrot.lane.b32.xlu2 %v455_v50, %s809_s22 }
 0x12a   : > { %785 = vpow2.f32 %v371_v10  ;;  %v596_v15 = vpop.permute.xlu2 %595 }
 0x12b   : > { %787 = vpow2.f32 %v367_v11  ;;  %v607_v18 = vsel %vm274_vm0, %v596_v15, 0.0 }
 0x12c   : > { %789 = vpow2.f32 %v369_v17 }
 0x12f   : > { %v924_v1 = vpop.eup %783 }
 0x130   : > { %v384_v2 = vsel %vm350_vm1, %v924_v1, 0.0  ;;  %v934_v16 = vpop.eup %785 }
 0x131   : > { %385 = vadd.xlane.f32.xlu1 %v384_v2  ;;  %601 = vrot.lane.b32.xlu2 %v455_v50, %s807_s19  ;;  %v937_v19 = vpop.eup %787  ;;  %v381_v20 = vsel %vm350_vm1, %v934_v16, 0.0 }
 0x132   : > { %v375_v21 = vsel %vm350_vm1, %v937_v19, 0.0  ;;  %v943_v22 = vpop.eup %789 }
 0x133   : > { %v378_v23 = vsel %vm350_vm1, %v943_v22, 0.0 }
 0x142   : > { %v548_v9 = vpop.permute.xlu0 %547 }
 0x143   : > { %v500_v5 = vpop.permute.xlu1 %499  ;;  %v559_v12 = vsel %vm274_vm0, %v548_v9, 0.0 }
 0x144   : > { %v511_v6 = vsel %vm274_vm0, %v500_v5, 0.0 }
 0x145   : > { %512 = vadd.xlane.f32.xlu1 %v511_v6 }
 0x14d   : > { %560 = vadd.xlane.f32.xlu1 %v559_v12 }
 0x150   : > { %485 = vadd.xlane.f32.xlu0 %v484_v13 }
 0x155   : > { %608 = vadd.xlane.f32.xlu1 %v607_v18 }
 0x158   : > { %382 = vadd.xlane.f32.xlu0 %v381_v20  ;;  %v782_v20 = vld [vmem:[%s1028_s3 + $0x1] ss:$0 sm:$0xff] }
 0x15a   : > { %376 = vadd.xlane.f32.xlu2 %v375_v21 }
 0x162   : > { %379 = vadd.xlane.f32.xlu2 %v378_v23 }
 0x16c   : > { %v947_v24 = vpop.xlane.xlu2 %482 }
 0x16d   : > { %v950_v27 = vpop.xlane.xlu0 %476 }
 0x16e   : > { %v960_v44 = vpop.xlane.xlu1 %479 }
 0x174   : > { %v502_v25 = vpop.permute.xlu2 %501 }
 0x175   : > { %v514_v26 = vsel %vm274_vm0, %v502_v25, 0.0 }
 0x176   : > { %515 = vadd.xlane.f32.xlu0 %v514_v26 }
 0x17c   : > { %v550_v28 = vpop.permute.xlu2 %549 }
 0x17d   : > { %v562_v39 = vsel %vm274_vm0, %v550_v28, 0.0 }
 0x180   : > { %v504_v29 = vpop.permute.xlu0 %503 }
 0x181   : > { %v517_v30 = vsel %vm274_vm0, %v504_v29, 0.0 }
 0x182   : > { %518 = vadd.xlane.f32.xlu2 %v517_v30 }
 0x184   : > { %v598_v31 = vpop.permute.xlu2 %597 }
 0x185   : > { %v610_v33 = vsel %vm274_vm0, %v598_v31, 0.0 }
 0x188   : > { %v552_v32 = vpop.permute.xlu0 %551 }
 0x189   : > { %v565_v34 = vsel %vm274_vm0, %v552_v32, 0.0 }
 0x18a   : > { %611 = vadd.xlane.f32.xlu2 %v610_v33  ;;  %566 = vadd.xlane.f32.xlu1 %v565_v34 }
 0x18c   : > { %v506_v37 = vpop.permute.xlu2 %505 }
 0x18d   : > { %v520_v42 = vsel %vm274_vm0, %v506_v37, 0.0 }
 0x190   : > { %v600_v35 = vpop.permute.xlu0 %599 }
 0x191   : > { %v613_v36 = vsel %vm274_vm0, %v600_v35, 0.0 }
 0x192   : > { %614 = vadd.xlane.f32.xlu1 %v613_v36 }
 0x194   : > { %v602_v41 = vpop.permute.xlu2 %601 }
 0x195   : > { %v616_v43 = vsel %vm274_vm0, %v602_v41, 0.0 }
 0x198   : > { %v554_v38 = vpop.permute.xlu0 %553 }
 0x199   : > { %v568_v40 = vsel %vm274_vm0, %v554_v38, 0.0 }
 0x19a   : > { %563 = vadd.xlane.f32.xlu1 %v562_v39  ;;  %569 = vadd.xlane.f32.xlu0 %v568_v40 }
 0x1a2   : > { %521 = vadd.xlane.f32.xlu1 %v520_v42  ;;  %617 = vadd.xlane.f32.xlu0 %v616_v43 }
 0x1a4   : > { %v386_v45 = vpop.xlane.xlu1 %385 }
 0x1a5   : > { %791 = vrcp.f32 %v386_v45  ;;  %vm437_vm6 = vweird.f32 %v386_v45  ;;  %v441_v5 = vand.u32 2147483647, %v386_v45  ;;  %v443_v6 = vand.u32 2147483648, %v386_v45 }
 0x1a7   : > { %v444_v21 = vor.u32 1.1754944e-38, %v443_v6  ;;  %vm442_vm13 = vcmp.eq.f32.partialorder %v441_v5, 8.507059e+37 }
 0x1ab   : > { %v792_v47 = vpop.eup %791 }
 0x1ac   : > { %v433_v49 = vmul.f32 %v792_v47, %v386_v45  ;;  %vm438_vm3 = vweird.f32 %v792_v47 }
 0x1ad   : > { %vm964_vm8 = vmor %vm437_vm6, %vm438_vm3 }
 0x1ae   : > { %v434_v51 = vsub.f32 1.0, %v433_v49 }
 0x1b0   : > { %v435_v55 = vmul.f32 %v792_v47, %v434_v51 }
 0x1b2   : > { %v436_v63 = vadd.f32 %v792_v47, %v435_v55 }
 0x1b4   : > { %v440_v12 = vsel %vm964_vm8, %v792_v47, %v436_v63 }
 0x1b5   : > { %v445_v29 = vsel %vm442_vm13, %v444_v21, %v440_v12 }
 0x1b6   : > { %v984_v35 = vmul.f32 %v924_v1, %v445_v29 }
 0x1b8   : > { %v513_v31 = vpop.xlane.xlu1 %512  ;;  %v462_v41 = vmul.f32 %v782_v20, %v984_v35 }
 0x1ba   : > { %v472_v45 = vsel %vm350_vm1, %v462_v41, 0.0 }
 0x1c0   : > { %v561_v43 = vpop.xlane.xlu1 %560 }
 0x1c3   : > { %v962_v46 = vpop.xlane.xlu0 %485 }
 0x1c8   : > { %v609_v47 = vpop.xlane.xlu1 %608 }
 0x1cb   : > { %v383_v48 = vpop.xlane.xlu0 %382 }
 0x1cc   : > { %793 = vrcp.f32 %v383_v48  ;;  %v428_v59 = vand.u32 2147483648, %v383_v48  ;;  %v426_v61 = vand.u32 2147483647, %v383_v48  ;;  %vm422_vm4 = vweird.f32 %v383_v48 }
 0x1cd   : > { %v377_v50 = vpop.xlane.xlu2 %376 }
 0x1ce   : > { %795 = vrcp.f32 %v377_v50  ;;  %v398_v0 = vand.u32 2147483648, %v377_v50  ;;  %v396_v4 = vand.u32 2147483647, %v377_v50  ;;  %v429_v7 = vor.u32 1.1754944e-38, %v428_v59 }
 0x1cf   : > { %vm427_vm9 = vcmp.eq.f32.partialorder %v426_v61, 8.507059e+37  ;;  %vm392_vm10 = vweird.f32 %v377_v50 }
 0x1d0   : > { %v399_v14 = vor.u32 1.1754944e-38, %v398_v0  ;;  %vm397_vm12 = vcmp.eq.f32.partialorder %v396_v4, 8.507059e+37 }
 0x1d2   : > { %v794_v52 = vpop.eup %793 }
 0x1d3   : > { %v418_v53 = vmul.f32 %v794_v52, %v383_v48  ;;  %vm423_vm2 = vweird.f32 %v794_v52 }
 0x1d4   : > { %v796_v54 = vpop.eup %795  ;;  %vm424_vm7 = vmor %vm422_vm4, %vm423_vm2 }
 0x1d5   : > { %v419_v56 = vsub.f32 1.0, %v418_v53  ;;  %v388_v57 = vmul.f32 %v796_v54, %v377_v50  ;;  %v380_v58 = vpop.xlane.xlu2 %379  ;;  %vm393_vm5 = vweird.f32 %v796_v54 }
 0x1d6   : > { %797 = vrcp.f32 %v380_v58  ;;  %vm394_vm11 = vmor %vm392_vm10, %vm393_vm5  ;;  %v411_v30 = vand.u32 2147483647, %v380_v58  ;;  %vm407_vm15 = vweird.f32 %v380_v58 }
 0x1d7   : > { %v420_v60 = vmul.f32 %v794_v52, %v419_v56  ;;  %v389_v62 = vsub.f32 1.0, %v388_v57 }
 0x1d8   : > { %vm412_vm2 = vcmp.eq.f32.partialorder %v411_v30, 8.507059e+37 }
 0x1d9   : > { %v421_v2 = vadd.f32 %v794_v52, %v420_v60  ;;  %v390_v3 = vmul.f32 %v796_v54, %v389_v62 }
 0x1db   : > { %v425_v9 = vsel %vm424_vm7, %v794_v52, %v421_v2  ;;  %v391_v10 = vadd.f32 %v796_v54, %v390_v3 }
 0x1dc   : > { %v798_v11 = vpop.eup %797  ;;  %v430_v13 = vsel %vm427_vm9, %v429_v7, %v425_v9 }
 0x1dd   : > { %v972_v15 = vmul.f32 %v934_v16, %v430_v13  ;;  %v395_v17 = vsel %vm394_vm11, %v796_v54, %v391_v10  ;;  %v403_v18 = vmul.f32 %v798_v11, %v380_v58  ;;  %v413_v16 = vand.u32 2147483648, %v380_v58 }
 0x1de   : > { %v400_v23 = vsel %vm397_vm12, %v399_v14, %v395_v17  ;;  %vm408_vm14 = vweird.f32 %v798_v11 }
 0x1df   : > { %v978_v25 = vmul.f32 %v937_v19, %v400_v23  ;;  %v404_v26 = vsub.f32 1.0, %v403_v18  ;;  %v461_v28 = vmul.f32 %v782_v20, %v972_v15  ;;  %vm409_vm0 = vmor %vm407_vm15, %vm408_vm14  ;;  %v414_v37 = vor.u32 1.1754944e-38, %v413_v16 }
 0x1e1   : > { %v405_v32 = vmul.f32 %v798_v11, %v404_v26  ;;  %v469_v33 = vsel %vm350_vm1, %v461_v28, 0.0  ;;  %v459_v34 = vmul.f32 %v782_v20, %v978_v25  ;;  %v619_v51 = vmul.f32 %v609_v47, %v978_v25 }
 0x1e2   : > { %470 = vadd.xlane.f32.xlu1 %v469_v33  ;;  %v571_v55 = vmul.f32 %v561_v43, %v978_v25  ;;  %v487_v8 = vmul.f32 %v950_v27, %v978_v25 }
 0x1e3   : > { %v406_v36 = vadd.f32 %v798_v11, %v405_v32  ;;  %v463_v19 = vsel %vm350_vm1, %v459_v34, 0.0  ;;  %v489_v32 = vmul.f32 %v947_v24, %v972_v15 }
 0x1e4   : > { %464 = vadd.xlane.f32.xlu2 %v463_v19 }
 0x1e5   : > { %v410_v38 = vsel %vm409_vm0, %v798_v11, %v406_v36 }
 0x1e6   : > { %v415_v39 = vsel %vm412_vm2, %v414_v37, %v410_v38 }
 0x1e7   : > { %v416_v40 = vmul.f32 %v943_v22, %v415_v39  ;;  %v523_v22 = vmul.f32 %v513_v31, %v978_v25  ;;  %v490_v31 = vmul.f32 %v962_v46, %v984_v35 }
 0x1e9   : > { %v460_v42 = vmul.f32 %v782_v20, %v416_v40  ;;  %v516_v48 = vpop.xlane.xlu0 %515  ;;  %v488_v21 = vmul.f32 %v960_v44, %v416_v40 }
 0x1ea   : > { %v524_v49 = vmul.f32 %v516_v48, %v416_v40 }
 0x1eb   : > { %v466_v1 = vsel %vm350_vm1, %v460_v42, 0.0  ;;  %vm643_vm1 = vcmask 7168  }
 0x1ec   : > { %473 = vadd.xlane.f32.xlu2 %v472_v45  ;;  %467 = vadd.xlane.f32.xlu0 %v466_v1 }
 0x1f5   : > { %v519_v52 = vpop.xlane.xlu2 %518 }
 0x1f6   : > { %v525_v54 = vmul.f32 %v519_v52, %v972_v15 }
 0x1fb   : > { %533 = vrot.lane.b32.xlu1 %v524_v49, %s810_s26 }
 0x1fd   : > { %v567_v50 = vpop.xlane.xlu1 %566  ;;  %v612_v63 = vpop.xlane.xlu2 %611 }
 0x1fe   : > { %v573_v59 = vmul.f32 %v567_v50, %v972_v15  ;;  %v620_v0 = vmul.f32 %v612_v63, %v416_v40 }
 0x200   : > { %627 = vrot.lane.b32.xlu0 %v619_v51, %s811_s27 }
 0x204   : > { %531 = vrot.lane.b32.xlu2 %v523_v22, %s810_s26 }
 0x205   : > { %v615_v53 = vpop.xlane.xlu1 %614 }
 0x206   : > { %v621_v3 = vmul.f32 %v615_v53, %v972_v15 }
 0x208   : > { %535 = vrot.lane.b32.xlu0 %v525_v54, %s810_s26 }
 0x20c   : > { %579 = vrot.lane.b32.xlu2 %v571_v55, %s812_s28 }
 0x20d   : > { %v564_v56 = vpop.xlane.xlu1 %563  ;;  %v570_v58 = vpop.xlane.xlu0 %569 }
 0x20e   : > { %v572_v57 = vmul.f32 %v564_v56, %v416_v40  ;;  %v574_v61 = vmul.f32 %v570_v58, %v984_v35 }
 0x210   : > { %581 = vrot.lane.b32.xlu1 %v572_v57, %s812_s28 }
 0x214   : > { %583 = vrot.lane.b32.xlu2 %v573_v59, %s812_s28 }
 0x215   : > { %v522_v60 = vpop.xlane.xlu1 %521  ;;  %v618_v2 = vpop.xlane.xlu0 %617 }
 0x216   : > { %v526_v62 = vmul.f32 %v522_v60, %v984_v35  ;;  %v622_v4 = vmul.f32 %v618_v2, %v984_v35 }
 0x218   : > { %537 = vrot.lane.b32.xlu0 %v526_v62, %s810_s26  ;;  %585 = vrot.lane.b32.xlu1 %v574_v61, %s812_s28 }
 0x21c   : > { %629 = vrot.lane.b32.xlu2 %v620_v0, %s811_s27 }
 0x220   : > { %631 = vrot.lane.b32.xlu0 %v621_v3, %s811_s27  ;;  %633 = vrot.lane.b32.xlu1 %v622_v4, %s811_s27 }
 0x255   : > { %v471_v14 = vpop.xlane.xlu1 %470 }
 0x256   : > { %v493_v44 = vadd.f32 %v489_v32, %v471_v14 }
 0x257   : > { %v465_v5 = vpop.xlane.xlu2 %464 }
 0x258   : > { %v491_v10 = vadd.f32 %v487_v8, %v465_v5 }
 0x25f   : > { %v474_v6 = vpop.xlane.xlu2 %473  ;;  %v468_v9 = vpop.xlane.xlu0 %467 }
 0x260   : > { %v492_v23 = vadd.f32 %v488_v21, %v468_v9  ;;  %v494_v36 = vadd.f32 %v490_v31, %v474_v6 }
 0x267   : > { %v532_v7 = vpop.permute.xlu2 %531 }
 0x268   : > { %v543_v11 = vadd.f32 %v532_v7, %v491_v10 }
 0x26d   : > { %v534_v27 = vpop.permute.xlu1 %533 }
 0x26e   : > { %v544_v25 = vadd.f32 %v534_v27, %v492_v23 }
 0x26f   : > { %v580_v12 = vpop.permute.xlu2 %579 }
 0x270   : > { %v591_v13 = vadd.f32 %v580_v12, %v543_v11 }
 0x272   : > { %v628_v17 = vpop.permute.xlu0 %627 }
 0x273   : > { %v639_v18 = vadd.f32 %v628_v17, %v591_v13 }
 0x275   : > { %644 = vst.msk [vmem:[%s1007_s5] sm:$0xff] %vm643_vm1, %v639_v18 }
 0x277   : > { %v584_v20 = vpop.permute.xlu2 %583 }
 0x27a   : > { %v536_v26 = vpop.permute.xlu0 %535 }
 0x27b   : > { %v545_v19 = vadd.f32 %v536_v26, %v493_v44 }
 0x27d   : > { %v593_v39 = vadd.f32 %v584_v20, %v545_v19 }
 0x27f   : > { %v630_v30 = vpop.permute.xlu2 %629 }
 0x282   : > { %v582_v28 = vpop.permute.xlu1 %581 }
 0x283   : > { %v592_v29 = vadd.f32 %v582_v28, %v544_v25 }
 0x285   : > { %v640_v16 = vadd.f32 %v630_v30, %v592_v29 }
 0x287   : > { %645 = vst.msk [vmem:[%s1007_s5 + $0x8] sm:$0xff] %vm643_vm1, %v640_v16 }
 0x28a   : > { %v586_v33 = vpop.permute.xlu1 %585  ;;  %v538_v34 = vpop.permute.xlu0 %537 }
 0x28b   : > { %v546_v37 = vadd.f32 %v538_v34, %v494_v36 }
 0x28d   : > { %v594_v38 = vadd.f32 %v586_v33, %v546_v37 }
 0x292   : > { %v634_v40 = vpop.permute.xlu1 %633  ;;  %v632_v41 = vpop.permute.xlu0 %631 }
 0x293   : > { %v642_v42 = vadd.f32 %v634_v40, %v594_v38  ;;  %v641_v43 = vadd.f32 %v632_v41, %v593_v39 }
 0x295   : > { %646 = vst.msk [vmem:[%s1007_s5 + $0x10] sm:$0xff] %vm643_vm1, %v641_v43 }
 0x296   : > { %647 = vst.msk [vmem:[%s1007_s5 + $0x18] sm:$0xff] %vm643_vm1, %v642_v42 }
 0x297 PF: > { %s14_s15 = sadd.s32 1, %s805_s15  }
 0x298   : > { %p11_p4 = scmp.ge.s32.totalorder %s14_s15, 4  }
 0x29a   :  { %13 = sbr.rel (!%p11_p4) target bundleno = 1 (0x1), region = 66 }

</bundles_post_ra>
